<compile_context>
chip_gen: v7x
topology: tpu7x:2x2x1
jax: 0.10.0
libtpu: 0.0.40
codegen_flags: <defaults>
</compile_context>

<pallas_src>
import jax
import jax.numpy as jnp
from jax.experimental import pallas as pl
from jax.experimental.pallas import tpu as pltpu

_IN_FEATURES = 784
_OUT_FEATURES = 10
_N_PAD = 128          # lane-dense output slab (one 128-lane vreg column)
_TM_MAX = 512         # row tile for large batches (per-step overhead ~0.35us)


# ----------------------------------------------------------------------------
# Fused Linear kernel: o = x @ wT + b   (bias add fused in the MXU epilogue)
# ----------------------------------------------------------------------------
def _fc_kernel(x_ref, w_ref, b_ref, o_ref):
    # x_ref: (tm, 784), w_ref: (784, 128), b_ref: (1, 128), o_ref: (tm, 128)
    acc = jnp.dot(x_ref[...], w_ref[...], preferred_element_type=jnp.float32)
    o_ref[...] = acc + b_ref[...]


def linear_pallas(x2d, wT_pad, b_pad):
    """y_slab = x2d @ wT_pad + b_pad   (returns the lane-dense (B, 128) slab).

    x2d:    (B, 784) f32
    wT_pad: (784, 128) f32  -- pre-transposed / pre-padded weights
    b_pad:  (1, 128)  f32   -- pre-padded bias
    """
    B, K = x2d.shape
    Np = wT_pad.shape[1]

    if B <= _TM_MAX:
        # Single grid step; block dim == full array dim, so no M padding at
        # all (legal even when B is not a multiple of 8).
        tm = B
        grid_m = 1
    else:
        # Tile M; "parallel" semantics lets v7x shard the M loop across its
        # two TensorCores.  Pallas masks the (possibly partial) last block.
        tm = _TM_MAX
        grid_m = pl.cdiv(B, tm)

    return pl.pallas_call(
        _fc_kernel,
        out_shape=jax.ShapeDtypeStruct((B, Np), jnp.float32),
        grid=(grid_m,),
        in_specs=[
            pl.BlockSpec((tm, K), lambda i: (i, 0)),    # x tile
            pl.BlockSpec((K, Np), lambda i: (0, 0)),    # full weight (resident)
            pl.BlockSpec((1, Np), lambda i: (0, 0)),    # bias row
        ],
        out_specs=pl.BlockSpec((tm, Np), lambda i: (i, 0)),
        compiler_params=pltpu.CompilerParams(
            dimension_semantics=("parallel",)),
    )(x2d, wT_pad, b_pad)


# ----------------------------------------------------------------------------
# Forward pass (mirrors FNN_1.forward)
# ----------------------------------------------------------------------------
def fnn1_forward_padded(x, params):
    """Returns the lane-dense (B, 128) logits slab (lanes >= 10 are zero)."""
    x2d = x.reshape(-1, _IN_FEATURES)                    # x.view(-1, 784), free
    return linear_pallas(x2d, params["fc1_wT"], params["fc1_b"])


def fnn1_forward(x, params):
    """Returns exactly (B, 10) logits (lanes-only slice of the slab)."""
    return fnn1_forward_padded(x, params)[:, :_OUT_FEATURES]


# ----------------------------------------------------------------------------
# Parameters
# ----------------------------------------------------------------------------
def init_raw_params(key):
    """PyTorch nn.Linear default init: U(-1/sqrt(fan_in), +1/sqrt(fan_in))."""
    kw, kb = jax.random.split(key)
    bound = 1.0 / (_IN_FEATURES ** 0.5)
    w = jax.random.uniform(kw, (_OUT_FEATURES, _IN_FEATURES), jnp.float32,
                           -bound, bound)
    b = jax.random.uniform(kb, (_OUT_FEATURES,), jnp.float32, -bound, bound)
    return {"fc1_w": w, "fc1_b": b}


def prepare_params(raw):
    """One-time transpose + pad so the forward pass has zero wrapper work."""
    wT = jnp.pad(raw["fc1_w"].T, ((0, 0), (0, _N_PAD - _OUT_FEATURES)))
    b = jnp.pad(raw["fc1_b"], (0, _N_PAD - _OUT_FEATURES)).reshape(1, _N_PAD)
    return {"fc1_wT": wT, "fc1_b": b}


if __name__ == "__main__":
    key = jax.random.PRNGKey(0)
    pkey, xkey = jax.random.split(key)
    raw = init_raw_params(pkey)
    params = prepare_params(raw)                         # done once, off the hot path
    x = jax.random.normal(xkey, (2, 1, 28, 28), jnp.float32)   # MNIST-shaped, batch=2

    fwd = jax.jit(fnn1_forward)
    logits = fwd(x, params)
    jax.block_until_ready(logits)

    # Reference check against plain XLA (uses the raw PyTorch-layout params).
    ref = x.reshape(2, -1) @ raw["fc1_w"].T + raw["fc1_b"]
    assert logits.shape == (2, _OUT_FEATURES)
    assert bool(jnp.all(jnp.isfinite(logits)))
    assert bool(jnp.allclose(logits, ref, atol=2e-2, rtol=2e-2))
    print("KERNEL_OK")
</pallas_src>

<mosaic_0001>
module attributes {stable_mosaic.version = 11 : i64} {
  func.func @_fc_kernel(%arg0: i32, %arg1: memref<2x784xf32, #tpu.memory_space<vmem>>, %arg2: memref<784x128xf32, #tpu.memory_space<vmem>>, %arg3: memref<1x128xf32, #tpu.memory_space<vmem>>, %arg4: memref<2x128xf32, #tpu.memory_space<vmem>>) attributes {dimension_semantics = [#tpu.dimension_semantics<parallel>], iteration_bounds = array<i64: 1>, scalar_prefetch = 0 : i64, scratch_operands = 0 : i64, tpu.core_type = #tpu.core_type<tc>, window_params = [{transform_indices = @transform_0, window_bounds = array<i64: 2, 784>}, {pipeline_mode = #tpu.pipeline_mode<synchronous>, transform_indices = @transform_1, window_bounds = array<i64: 784, 128>}, {pipeline_mode = #tpu.pipeline_mode<synchronous>, transform_indices = @transform_2, window_bounds = array<i64: 1, 128>}, {transform_indices = @transform_3, window_bounds = array<i64: 2, 128>}]} {
    %c0 = arith.constant 0 : index
    %c0_0 = arith.constant 0 : index
    %0 = vector.load %arg1[%c0, %c0_0] : memref<2x784xf32, #tpu.memory_space<vmem>>, vector<2x784xf32>
    %c0_1 = arith.constant 0 : index
    %c0_2 = arith.constant 0 : index
    %1 = vector.load %arg2[%c0_1, %c0_2] : memref<784x128xf32, #tpu.memory_space<vmem>>, vector<784x128xf32>
    %cst = arith.constant dense<0.000000e+00> : vector<2x128xf32>
    %2 = tpu.matmul %0, %1, %cst {dimension_numbers = #tpu.dot_dimension_numbers<[1], [0], [0], [1], [0, 0, 1, 1], [], []>} : vector<2x784xf32>, vector<784x128xf32>, vector<2x128xf32> -> vector<2x128xf32>
    %c0_3 = arith.constant 0 : index
    %c0_4 = arith.constant 0 : index
    %3 = vector.load %arg3[%c0_3, %c0_4] : memref<1x128xf32, #tpu.memory_space<vmem>>, vector<1x128xf32>
    %4 = vector.broadcast %3 : vector<1x128xf32> to vector<2x128xf32>
    %5 = arith.addf %2, %4 : vector<2x128xf32>
    %c0_5 = arith.constant 0 : index
    %c0_6 = arith.constant 0 : index
    %6 = vector.load %arg4[%c0_5, %c0_6] : memref<2x128xf32, #tpu.memory_space<vmem>>, vector<2x128xf32>
    tpu.vector_store %arg4[%c0_5, %c0_6], %5 {strides = array<i32>} : memref<2x128xf32, #tpu.memory_space<vmem>>, vector<2x128xf32>,
    return
  }
  func.func @transform_0(%arg0: i32) -> (i32, i32) {
    %c0_i32 = arith.constant 0 : i32
    %c0_i32_0 = arith.constant 0 : i32
    return %arg0, %c0_i32 : i32, i32
  }
  func.func @transform_1(%arg0: i32) -> (i32, i32) {
    %c0_i32 = arith.constant 0 : i32
    %c0_i32_0 = arith.constant 0 : i32
    %c0_i32_1 = arith.constant 0 : i32
    return %c0_i32, %c0_i32_0 : i32, i32
  }
  func.func @transform_2(%arg0: i32) -> (i32, i32) {
    %c0_i32 = arith.constant 0 : i32
    %c0_i32_0 = arith.constant 0 : i32
    %c0_i32_1 = arith.constant 0 : i32
    return %c0_i32, %c0_i32_0 : i32, i32
  }
  func.func @transform_3(%arg0: i32) -> (i32, i32) {
    %c0_i32 = arith.constant 0 : i32
    %c0_i32_0 = arith.constant 0 : i32
    return %arg0, %c0_i32 : i32, i32
  }
}

</mosaic_0001>

<bundles_post_ra>
// kernel: fnn1_forward.1
= control target key start
LH: loop header
LB: loop body
LE: loop exit
PB: predicated region body
PF: predicated region fallthrough
CT: control target
= control target key end

     0   :  { %8 = vsyncpa [#allocation3], 0  ;;  %s822_s0 = inlined_call_operand.vmem [shape: f32[2,784], index: 0, kind: input, shape index: {}]   ;;  %s823_s1 = inlined_call_operand.hbm [shape: f32[784,128], index: 1, kind: input, shape index: {}]   ;;  %s824_s2 = inlined_call_operand.vmem [shape: f32[1,128], index: 2, kind: input, shape index: {}]   ;;  %s825_s3 = inlined_call_operand.hbm [shape: f32[2,128], index: 3, kind: output, shape index: {}]  }
   0x1   :  { %9 = vsyncpa [#allocation4], 0  ;;  %s750_s12 = smov [#allocation2]   ;;  %s702_s16 = scalar_lea.hbm %s823_s1, 12544 }
   0x2   :  { %s17_s13 = sshll.u32 %s750_s12, 4  ;;  %p703_p0 = scmp.ne.s32.totalorder %s823_s1, %s702_s16  ;;  %s18_s13 = int_to_ptr.vmem [resolvable:$true] %s17_s13 }
   0x3   :  { %p706_p1 = scmp.lt.u32.totalorder %s702_s16, %s823_s1 }
   0x5   :  { %p708_p2 = pnand %p706_p1, %p703_p0 }
   0x7   :  { %711 = shalt.err (!%p708_p2)
}
   0x8   :  { %s712_s21 = scalar_lea.vmem %s18_s13, 12544  ;;  %p717_p4 = scmp.lt.s32.totalorder %s18_s13, %s18_s13 }
   0x9   :  { %p713_p3 = scmp.ne.s32.totalorder %s18_s13, %s712_s21  ;;  %p718_p5 = scmp.lt.s32.totalorder %s712_s21, %s712_s21 }
   0xb   :  { %p719_p6 = por %p718_p5, %p717_p4 }
   0xd   :  { %p720_p7 = pnand %p719_p6, %p713_p3 }
   0xf   :  { %723 = shalt.err (!%p720_p7)
}
  0x10   :  { %s751_s22 = smov 128   ;;  %s752_s23 = smov 8  }
  0x11   :  { %23 = dma.hbm_to_vmem [thread:$0]  %s823_s1, 12544, %s18_s13, [#allocation3], %s751_s22, %s751_s22, %s752_s23  }
  0x12   :  { %746 = dma.done.wait [#allocation3], 12544  }
  0x13   :  { %747 = vsyncadd [#allocation3], 4294954752  ;;  %v47_v0 = vld [vmem:[#allocation2 + $0x80] sm:$0xff]  ;;  %v48_v1 = vld [vmem:[#allocation2 + $0x88] sm:$0xff]  ;;  %v753_v43 = vmov 1983009808   ;;  %v142_v45 = vlaneseq }
  0x14   :  { %v31_v2 = vld [vmem:[#allocation2] sm:$0xff]  ;;  %v593_v3 = vpack.c.bf16 %v48_v1, %v47_v0  ;;  %v32_v4 = vld [vmem:[#allocation2 + $0x8] sm:$0xff]  ;;  %v49_v11 = vld [vmem:[#allocation2 + $0x90] sm:$0xff]  ;;  %v140_v44 = vunpack.c.l.s4 %v753_v43  ;;  %vm755_vm0 = vmmov 0   ;;  %vm177_vm1 = vcmask 130048   ;;  %s757_s30 = smov [#allocation5]  }
  0x15   :  { %v79_v5 = vld [vmem:[#allocation2 + $0x180] sm:$0xff]  ;;  %v80_v6 = vld [vmem:[#allocation2 + $0x188] sm:$0xff]  ;;  %v595_v7 = vpack.c.bf16 %v32_v4, %v31_v2  ;;  %v50_v13 = vld [vmem:[#allocation2 + $0x98] sm:$0xff]  ;;  %v143_v60 = vshrl.u32 %v142_v45, 7  ;;  %s467_s4 = sshll.u32 %s757_s30, 4  ;;  %s468_s4 = int_to_ptr.vmem [resolvable:$true] %s467_s4 }
  0x16   :  { %v625_v8 = vpack.c.bf16 %v80_v6, %v79_v5  ;;  %v63_v9 = vld [vmem:[#allocation2 + $0x100] sm:$0xff]  ;;  %v64_v10 = vld [vmem:[#allocation2 + $0x108] sm:$0xff]  ;;  %594 = vmatprep.subr.bf16.mxu0 %v593_v3  ;;  %v33_v14 = vld [vmem:[#allocation2 + $0x10] sm:$0xff]  ;;  %v597_v16 = vpack.c.bf16 %v50_v13, %v49_v11  ;;  %v141_v59 = vunpack.c.0.s8 %v140_v44  ;;  %s724_s5 = scalar_lea.vmem %s468_s4, 32  ;;  %p729_p9 = scmp.lt.s32.totalorder %s468_s4, %s468_s4 }
  0x17   :  { %v627_v12 = vpack.c.bf16 %v64_v10, %v63_v9  ;;  %v34_v15 = vld [vmem:[#allocation2 + $0x18] sm:$0xff]  ;;  %596 = vmatpush3.bf16.msra.mxu0 %v595_v7  ;;  %v81_v18 = vld [vmem:[#allocation2 + $0x190] sm:$0xff]  ;;  %v51_v23 = vld [vmem:[#allocation2 + $0xa0] sm:$0xff]  ;;  %p725_p8 = scmp.ne.s32.totalorder %s468_s4, %s724_s5  ;;  %p730_p10 = scmp.lt.s32.totalorder %s724_s5, %s724_s5 }
  0x18   :  { %626 = vmatprep.subr.bf16.mxu1 %v625_v8  ;;  %v599_v17 = vpack.c.bf16 %v34_v15, %v33_v14  ;;  %v82_v19 = vld [vmem:[#allocation2 + $0x198] sm:$0xff]  ;;  %v65_v20 = vld [vmem:[#allocation2 + $0x110] sm:$0xff]  ;;  %v52_v24 = vld [vmem:[#allocation2 + $0xa8] sm:$0xff]  ;;  %598 = vmatprep.subr.bf16.mxu0 %v597_v16  ;;  %v790_v10 = vsub.s32 %v141_v59, %v143_v60 }
  0x19   :  { %628 = vmatpush3.bf16.msra.mxu1 %v627_v12  ;;  %v629_v21 = vpack.c.bf16 %v82_v19, %v81_v18  ;;  %v66_v22 = vld [vmem:[#allocation2 + $0x118] sm:$0xff]  ;;  %v601_v26 = vpack.c.bf16 %v52_v24, %v51_v23  ;;  %v35_v27 = vld [vmem:[#allocation2 + $0x20] sm:$0xff]  ;;  %v36_v28 = vld [vmem:[#allocation2 + $0x28] sm:$0xff]  ;;  %p731_p11 = por %p730_p10, %p729_p9 }
  0x1a   :  { %v631_v25 = vpack.c.bf16 %v66_v22, %v65_v20  ;;  %v83_v29 = vld [vmem:[#allocation2 + $0x1a0] sm:$0xff]  ;;  %v84_v30 = vld [vmem:[#allocation2 + $0x1a8] sm:$0xff]  ;;  %v603_v33 = vpack.c.bf16 %v36_v28, %v35_v27  ;;  %v53_v35 = vld [vmem:[#allocation2 + $0xb0] sm:$0xff] }
  0x1b   :  { %630 = vmatprep.subr.bf16.mxu1 %v629_v21  ;;  %v67_v31 = vld [vmem:[#allocation2 + $0x120] sm:$0xff]  ;;  %v68_v32 = vld [vmem:[#allocation2 + $0x128] sm:$0xff]  ;;  %600 = vmatpush3.bf16.msra.mxu0 %v599_v17  ;;  %v633_v34 = vpack.c.bf16 %v84_v30, %v83_v29  ;;  %v54_v36 = vld [vmem:[#allocation2 + $0xb8] sm:$0xff]  ;;  %p732_p12 = pnand %p731_p11, %p725_p8 }
  0x1c   :  { %v37_v37 = vld [vmem:[#allocation2 + $0x30] sm:$0xff]  ;;  %602 = vmatprep.subr.bf16.mxu0 %v601_v26  ;;  %v635_v38 = vpack.c.bf16 %v68_v32, %v67_v31  ;;  %v605_v39 = vpack.c.bf16 %v54_v36, %v53_v35  ;;  %v38_v40 = vld [vmem:[#allocation2 + $0x38] sm:$0xff]  ;;  %v55_v49 = vld [vmem:[#allocation2 + $0xc0] sm:$0xff] }
  0x1d   :  { %632 = vmatpush3.bf16.msra.mxu1 %v631_v25  ;;  %v85_v41 = vld [vmem:[#allocation2 + $0x1b0] sm:$0xff]  ;;  %v86_v42 = vld [vmem:[#allocation2 + $0x1b8] sm:$0xff]  ;;  %v56_v50 = vld [vmem:[#allocation2 + $0xc8] sm:$0xff]  ;;  %v607_v51 = vpack.c.bf16 %v38_v40, %v37_v37 }
  0x1e   :  { %634 = vmatprep.subr.bf16.mxu1 %v633_v34  ;;  %v637_v46 = vpack.c.bf16 %v86_v42, %v85_v41  ;;  %v69_v47 = vld [vmem:[#allocation2 + $0x130] sm:$0xff]  ;;  %v70_v48 = vld [vmem:[#allocation2 + $0x138] sm:$0xff]  ;;  %v87_v52 = vld [vmem:[#allocation2 + $0x1c0] sm:$0xff]  ;;  %v609_v55 = vpack.c.bf16 %v56_v50, %v55_v49 }
  0x1f   :  { %604 = vmatpush3.bf16.msra.mxu0 %v603_v33  ;;  %v88_v53 = vld [vmem:[#allocation2 + $0x1c8] sm:$0xff]  ;;  %v639_v54 = vpack.c.bf16 %v70_v48, %v69_v47  ;;  %v39_v56 = vld [vmem:[#allocation2 + $0x40] sm:$0xff]  ;;  %v57_v63 = vld [vmem:[#allocation2 + $0xd0] sm:$0xff] }
  0x20   :  { %606 = vmatprep.subr.bf16.mxu0 %v605_v39  ;;  %v40_v57 = vld [vmem:[#allocation2 + $0x48] sm:$0xff]  ;;  %v71_v58 = vld [vmem:[#allocation2 + $0x140] sm:$0xff]  ;;  %v641_v61 = vpack.c.bf16 %v88_v53, %v87_v52  ;;  %v58_v0 = vld [vmem:[#allocation2 + $0xd8] sm:$0xff] }
  0x21   :  { %636 = vmatpush3.bf16.msra.mxu1 %v635_v38  ;;  %v72_v62 = vld [vmem:[#allocation2 + $0x148] sm:$0xff]  ;;  %v89_v1 = vld [vmem:[#allocation2 + $0x1d0] sm:$0xff]  ;;  %v90_v2 = vld [vmem:[#allocation2 + $0x1d8] sm:$0xff]  ;;  %v611_v3 = vpack.c.bf16 %v40_v57, %v39_v56  ;;  %v613_v6 = vpack.c.bf16 %v58_v0, %v57_v63 }
  0x22   :  { %638 = vmatprep.subr.bf16.mxu1 %v637_v46  ;;  %v41_v4 = vld [vmem:[#allocation2 + $0x50] sm:$0xff]  ;;  %v643_v5 = vpack.c.bf16 %v72_v62, %v71_v58  ;;  %v42_v7 = vld [vmem:[#allocation2 + $0x58] sm:$0xff]  ;;  %v645_v11 = vpack.c.bf16 %v90_v2, %v89_v1  ;;  %v59_v12 = vld [vmem:[#allocation2 + $0xe0] sm:$0xff]  ;;  %v754_v62 = vmov 0.0|0.0  }
  0x23   :  { %608 = vmatpush3.bf16.msra.mxu0 %v607_v51  ;;  %v73_v8 = vld [vmem:[#allocation2 + $0x150] sm:$0xff]  ;;  %v74_v9 = vld [vmem:[#allocation2 + $0x158] sm:$0xff]  ;;  %v60_v13 = vld [vmem:[#allocation2 + $0xe8] sm:$0xff]  ;;  %v615_v16 = vpack.c.bf16 %v42_v7, %v41_v4 }
  0x24   :  { %610 = vmatprep.subr.bf16.mxu0 %v609_v55  ;;  %v91_v14 = vld [vmem:[#allocation2 + $0x1e0] sm:$0xff]  ;;  %v92_v15 = vld [vmem:[#allocation2 + $0x1e8] sm:$0xff]  ;;  %v647_v17 = vpack.c.bf16 %v74_v9, %v73_v8  ;;  %v617_v19 = vpack.c.bf16 %v60_v13, %v59_v12  ;;  %v61_v27 = vld [vmem:[#allocation2 + $0xf0] sm:$0xff]  ;;  %v756_v8 = vmov 0.0  }
  0x25   :  { %640 = vmatpush3.bf16.msra.mxu1 %v639_v54  ;;  %v29_v18 = vld [vmem:[%s822_s0] sm:$0xff]  ;;  %v44_v21 = vld [vmem:[#allocation2 + $0x68] sm:$0xff]  ;;  %v649_v25 = vpack.c.bf16 %v92_v15, %v91_v14  ;;  %v62_v28 = vld [vmem:[#allocation2 + $0xf8] sm:$0xff] }
  0x26   :  { %642 = vmatprep.subr.bf16.mxu1 %v641_v61  ;;  %v43_v20 = vld [vmem:[#allocation2 + $0x60] sm:$0xff]  ;;  %v145_v23 = vrot.slane %v29_v18, %v790_v10  ;;  %v138_v24 = vcombine.high %v29_v18, %v29_v18  ;;  %v76_v26 = vld [vmem:[#allocation2 + $0x168] sm:$0xff]  ;;  %v93_v29 = vld [vmem:[#allocation2 + $0x1f0] sm:$0xff]  ;;  %v621_v35 = vpack.c.bf16 %v62_v28, %v61_v27 }
  0x27   :  { %612 = vmatpush3.bf16.msra.mxu0 %v611_v3  ;;  %v75_v22 = vld [vmem:[#allocation2 + $0x160] sm:$0xff]  ;;  %v94_v30 = vld [vmem:[#allocation2 + $0x1f8] sm:$0xff]  ;;  %v619_v33 = vpack.c.bf16 %v44_v21, %v43_v20  ;;  %v45_v36 = vld [vmem:[#allocation2 + $0x70] sm:$0xff] }
  0x28   :  { %614 = vmatprep.subr.bf16.mxu0 %v613_v6  ;;  %v153_v31 = vcombine.high %v145_v23, %v145_v23  ;;  %v152_v32 = vrot.slane %v138_v24, %v790_v10  ;;  %v651_v34 = vpack.c.bf16 %v76_v26, %v75_v22  ;;  %v46_v37 = vld [vmem:[#allocation2 + $0x78] sm:$0xff]  ;;  %v77_v38 = vld [vmem:[#allocation2 + $0x170] sm:$0xff]  ;;  %v653_v40 = vpack.c.bf16 %v94_v30, %v93_v29  ;;  %v111_v42 = vld [vmem:[#allocation2 + $0x280] sm:$0xff] }
  0x29   :  { %644 = vmatpush3.bf16.msra.mxu1 %v643_v5  ;;  %v78_v41 = vld [vmem:[#allocation2 + $0x178] sm:$0xff]  ;;  %v112_v43 = vld [vmem:[#allocation2 + $0x288] sm:$0xff]  ;;  %v623_v44 = vpack.c.bf16 %v46_v37, %v45_v36  ;;  %v95_v47 = vld [vmem:[#allocation2 + $0x200] sm:$0xff] }
  0x2a   :  { %646 = vmatprep.subr.bf16.mxu1 %v645_v11  ;;  %v154_v39 = vcombine.high %v152_v32, %v152_v32  ;;  %244 = vmatprep.mubr.f32.mxu0 %v153_v31  ;;  %v655_v45 = vpack.c.bf16 %v78_v41, %v77_v38  ;;  %v657_v46 = vpack.c.bf16 %v112_v43, %v111_v42  ;;  %v96_v48 = vld [vmem:[#allocation2 + $0x208] sm:$0xff]  ;;  %v113_v49 = vld [vmem:[#allocation2 + $0x290] sm:$0xff]  ;;  %v114_v50 = vld [vmem:[#allocation2 + $0x298] sm:$0xff] }
  0x2b   :  { %616 = vmatpush3.bf16.msra.mxu0 %v615_v16  ;;  %v659_v51 = vpack.c.bf16 %v96_v48, %v95_v47  ;;  %v30_v52 = vld [vmem:[%s822_s0 + $0x8] sm:$0x3f]  ;;  %v127_v53 = vld [vmem:[#allocation2 + $0x300] sm:$0xff]  ;;  %v661_v54 = vpack.c.bf16 %v114_v50, %v113_v49  ;;  %v97_v55 = vld [vmem:[#allocation2 + $0x210] sm:$0xff] }
  0x2c   :  { %618 = vmatprep.subr.bf16.mxu0 %v617_v19  ;;  %314 = vmatprep.mubr.f32.mxu1 %v154_v39  ;;  %v98_v56 = vld [vmem:[#allocation2 + $0x218] sm:$0xff]  ;;  %v155_v57 = vcombine.high %v30_v52, %v30_v52  ;;  %v801_v58 = vrot.slane %v30_v52, %v790_v10  ;;  %v128_v59 = vld [vmem:[#allocation2 + $0x308] sm:$0xff]  ;;  %v115_v60 = vld [vmem:[#allocation2 + $0x2a0] sm:$0xff] }
  0x2d   :  { %648 = vmatpush3.bf16.msra.mxu1 %v647_v17  ;;  %v116_v61 = vld [vmem:[#allocation2 + $0x2a8] sm:$0xff]  ;;  %v690_v63 = vpack.c.bf16 %v128_v59, %v127_v53  ;;  %v663_v1 = vpack.c.bf16 %v98_v56, %v97_v55  ;;  %v99_v3 = vld [vmem:[#allocation2 + $0x220] sm:$0xff]  ;;  %v117_v6 = vld [vmem:[#allocation2 + $0x2b0] sm:$0xff] }
  0x2e   :  { %650 = vmatprep.subr.bf16.mxu1 %v649_v25  ;;  %v170_v0 = vcombine.high %v801_v58, %v801_v58  ;;  %v665_v2 = vpack.c.bf16 %v116_v61, %v115_v60  ;;  %v100_v4 = vld [vmem:[#allocation2 + $0x228] sm:$0xff]  ;;  %v169_v5 = vrot.slane %v155_v57, %v790_v10  ;;  %v118_v7 = vld [vmem:[#allocation2 + $0x2b8] sm:$0xff]  ;;  %v101_v12 = vld [vmem:[#allocation2 + $0x230] sm:$0xff] }
  0x2f   :  { %620 = vmatpush3.bf16.msra.mxu0 %v619_v33  ;;  %v667_v9 = vpack.c.bf16 %v100_v4, %v99_v3  ;;  %v669_v11 = vpack.c.bf16 %v118_v7, %v117_v6  ;;  %v102_v13 = vld [vmem:[#allocation2 + $0x238] sm:$0xff]  ;;  %v119_v14 = vld [vmem:[#allocation2 + $0x2c0] sm:$0xff]  ;;  %v120_v15 = vld [vmem:[#allocation2 + $0x2c8] sm:$0xff] }
  0x30   :  { %622 = vmatprep.subr.bf16.mxu0 %v621_v35  ;;  %v671_v16 = vpack.c.bf16 %v102_v13, %v101_v12  ;;  %v673_v10 = vpack.c.bf16 %v120_v15, %v119_v14  ;;  %v103_v17 = vld [vmem:[#allocation2 + $0x240] sm:$0xff]  ;;  %v104_v18 = vld [vmem:[#allocation2 + $0x248] sm:$0xff]  ;;  %v121_v19 = vld [vmem:[#allocation2 + $0x2d0] sm:$0xff] }
  0x31   :  { %652 = vmatpush3.bf16.msra.mxu1 %v651_v34  ;;  %v122_v20 = vld [vmem:[#allocation2 + $0x2d8] sm:$0xff]  ;;  %v675_v21 = vpack.c.bf16 %v104_v18, %v103_v17  ;;  %v123_v25 = vld [vmem:[#allocation2 + $0x2e0] sm:$0xff]  ;;  %v124_v26 = vld [vmem:[#allocation2 + $0x2e8] sm:$0xff] }
  0x32   :  { %654 = vmatprep.subr.bf16.mxu1 %v653_v40  ;;  %v677_v22 = vpack.c.bf16 %v122_v20, %v121_v19  ;;  %v106_v24 = vld [vmem:[#allocation2 + $0x258] sm:$0xff]  ;;  %v681_v28 = vpack.c.bf16 %v124_v26, %v123_v25  ;;  %v107_v29 = vld [vmem:[#allocation2 + $0x260] sm:$0xff]  ;;  %v108_v30 = vld [vmem:[#allocation2 + $0x268] sm:$0xff] }
  0x33   :  { %624 = vmatpush3.bf16.msra.mxu0 %v623_v44  ;;  %v125_v31 = vld [vmem:[#allocation2 + $0x2f0] sm:$0xff]  ;;  %v683_v33 = vpack.c.bf16 %v108_v30, %v107_v29  ;;  %v110_v36 = vld [vmem:[#allocation2 + $0x278] sm:$0xff]  ;;  %v476_v39 = vld [vmem:[%s824_s2] ss:$0 sm:$0xff] }
  0x34   :  { %658 = vmatprep.subr.bf16.mxu0 %v657_v46  ;;  %v109_v35 = vld [vmem:[#allocation2 + $0x270] sm:$0xff] }
  0x35   :  { %656 = vmatpush3.bf16.msra.mxu1 %v655_v45  ;;  %v687_v37 = vpack.c.bf16 %v110_v36, %v109_v35 }
  0x36   :  { %689 = vmatprep.subr.bf16.mxu1 %v754_v62  ;;  %245 = vmatmul.mubr.f32.vlgmr.msra.gmra.mrb[0].mxu0 %v145_v23  ;;  %v105_v23 = vld [vmem:[#allocation2 + $0x250] sm:$0xff] }
  0x37   :  { %660 = vmatpush3.bf16.msra.mxu0 %v659_v51  ;;  %384 = vmatprep.mubr.f32.mxu0 %v170_v0  ;;  %v679_v27 = vpack.c.bf16 %v106_v24, %v105_v23 }
  0x38   :  { %315 = vmatmul.mubr.f32.vlgmr.msra.gmra.mrb[0].mxu1 %v152_v32  ;;  %662 = vmatprep.subr.bf16.mxu0 %v661_v54  ;;  %v126_v32 = vld [vmem:[#allocation2 + $0x2f8] sm:$0xff] }
  0x39   :  { %691 = vmatpush3.bf16.msra.mxu1 %v690_v63  ;;  %590 = vmatprep.mubr.msk.f32.mxu1 %vm755_vm0, %v756_v8  ;;  %v685_v34 = vpack.c.bf16 %v126_v32, %v125_v31 }
  0x3b   :  { %664 = vmatpush3.bf16.msra.mxu0 %v663_v1 }
  0x3c   :  { %666 = vmatprep.subr.bf16.mxu0 %v665_v2  ;;  %591 = vmatmul.mubr.msk.f32.vlgmr.msra.gmra.mrb[2].mxu1 %vm177_vm1, %v169_v5 }
  0x3f   :  { %668 = vmatpush3.bf16.msra.mxu0 %v667_v9 }
  0x40   :  { %670 = vmatprep.subr.bf16.mxu0 %v669_v11 }
  0x43   :  { %672 = vmatpush3.bf16.msra.mxu0 %v671_v16 }
  0x44   :  { %674 = vmatprep.subr.bf16.mxu0 %v673_v10 }
  0x47   :  { %676 = vmatpush3.bf16.msra.mxu0 %v675_v21 }
  0x48   :  { %678 = vmatprep.subr.bf16.mxu0 %v677_v22 }
  0x4b   :  { %680 = vmatpush3.bf16.msra.mxu0 %v679_v27 }
  0x4c   :  { %682 = vmatprep.subr.bf16.mxu0 %v681_v28 }
  0x4f   :  { %684 = vmatpush3.bf16.msra.mxu0 %v683_v33 }
  0x50   :  { %686 = vmatprep.subr.bf16.mxu0 %v685_v34 }
  0x53   :  { %688 = vmatpush3.bf16.msra.mxu0 %v687_v37 }
  0x56   :  { %385 = vmatmul.mubr.f32.vlgmr.msra.gmra.mrb[2].mxu0 %v801_v58 }
 0x109   :  { %v510_v38 = vpop.f32.mrb[0].mxu0 }
 0x10a   :  { %v511_v40 = vpop.f32.mrb[1].mxu0 }
 0x10b   :  { %v545_v41 = vpop.f32.mrb[0].mxu1  ;;  %v512_v42 = vadd.f32 %v511_v40, %v510_v38 }
 0x10c   :  { %v546_v43 = vpop.f32.mrb[1].mxu1 }
 0x10d   :  { %v547_v44 = vadd.f32 %v546_v43, %v545_v41  ;;  %v247_v45 = vadd.f32 %v512_v42, %v476_v39 }
 0x10f   :  { %v317_v46 = vadd.f32 %v547_v44, %v247_v45  ;;  %v456_v47 = vpop.f32.mrb[2].mxu1 }
 0x110   :  { %v592_v48 = vpop.f32.mrb[3].mxu1 }
 0x129   :  { %v580_v49 = vpop.f32.mrb[2].mxu0 }
 0x12a   :  { %v581_v50 = vpop.f32.mrb[3].mxu0 }
 0x12b   :  { %v582_v51 = vadd.f32 %v581_v50, %v580_v49 }
 0x12d   :  { %v387_v52 = vadd.f32 %v582_v51, %v317_v46 }
 0x12f   :  { %v457_v53 = vadd.f32 %v456_v47, %v387_v52 }
 0x131   :  { %460 = vst [vmem:[#allocation5] sm:$0x3] %v457_v53 }
 0x132   :  { %735 = shalt.err (!%p732_p12)
}
 0x133   :  { %s736_s7 = scalar_lea.hbm %s825_s3, 32 }
 0x134   :  { %p737_p13 = scmp.ne.s32.totalorder %s825_s3, %s736_s7  ;;  %p740_p0 = scmp.lt.u32.totalorder %s736_s7, %s825_s3 }
 0x136   :  { %p742_p1 = pnand %p740_p0, %p737_p13 }
 0x138   :  { %745 = shalt.err (!%p742_p1)
}
 0x139   :  { %470 = dma.vmem_to_hbm [thread:$0]  %s468_s4, 32, %s825_s3, [#allocation4]  }
 0x13a   :  { %748 = dma.done.wait [#allocation4], 32  }
 0x13b   :  { %749 = vsyncadd [#allocation4], 4294967264 }
 0x13c   :  { %474 = vsyncpa [#allocation3], 1 }
 0x13d   :  { %475 = vsyncpa [#allocation4], 1 }

</bundles_post_ra>
